<compile_context>
chip_gen: v7x
topology: tpu7x:2x2x1
jax: 0.10.0
libtpu: 0.0.40
codegen_flags: <defaults>
</compile_context>

<pallas_src>
import functools

import numpy as np
import jax
import jax.numpy as jnp
from jax import lax
from jax.experimental import pallas as pl
from jax.experimental.pallas import tpu as pltpu


def _round_up(x, m):
    return ((x + m - 1) // m) * m


def _cdiv(a, b):
    return -(-a // b)


# ----------------------------------------------------------------------------
# Deterministic parameter initialization (mirrors EchoStateNetwork.__init__)
# ----------------------------------------------------------------------------
def init_esn_params(input_size, reservoir_size, *, spectral_radius=0.95,
                    input_scaling=1.0, connectivity=0.1, bias_scaling=0.0,
                    seed=0):
    rng = np.random.RandomState(seed)

    # W_in: (R, I+1), uniform(-input_scaling, input_scaling); bias column.
    W_in = rng.uniform(-input_scaling, input_scaling,
                       size=(reservoir_size, input_size + 1)).astype(np.float32)
    if bias_scaling > 0:
        W_in[:, -1] = rng.uniform(-bias_scaling, bias_scaling,
                                  size=(reservoir_size,)).astype(np.float32)
    else:
        W_in[:, -1] = 0.0

    # Sparse reservoir matrix, rescaled to the desired spectral radius.
    W_res = np.zeros((reservoir_size, reservoir_size), dtype=np.float32)
    n_connections = int(connectivity * reservoir_size ** 2)
    for _ in range(n_connections):
        i = rng.randint(0, reservoir_size)
        j = rng.randint(0, reservoir_size)
        W_res[i, j] = rng.uniform(-1.0, 1.0)
    eigvals = np.linalg.eigvals(W_res.astype(np.float64))
    cur_sr = float(np.max(np.abs(eigvals)).real)
    if cur_sr > 0:
        W_res = (W_res * (spectral_radius / cur_sr)).astype(np.float32)

    return jnp.asarray(W_in), jnp.asarray(W_res)


# ----------------------------------------------------------------------------
# Pallas kernel: one grid step == `time_chunk` timesteps for one batch tile
# ----------------------------------------------------------------------------
def _esn_kernel(u_ref, w_hbm_ref, out_ref, w_vmem_ref, state_ref, dma_sem,
                *, leaking_rate, time_chunk, unroll):
    # Per-batch-tile init (time-chunk index == 0): start the weight DMA first
    # so it overlaps zeroing the state, then wait right before it is needed.
    @pl.when(pl.program_id(1) == 0)
    def _init():
        cp = pltpu.make_async_copy(w_hbm_ref, w_vmem_ref, dma_sem)
        cp.start()
        state_ref[...] = jnp.zeros_like(state_ref)
        cp.wait()

    w = w_vmem_ref[...]                       # (R_pad, R_pad), VMEM-resident
    a = jnp.float32(leaking_rate)

    # TODO(synk): noise_level > 0 would add Gaussian noise here via
    # pltpu.prng_seed / pltpu.prng_random_bits; module default is 0.0.

    def step(t, state):
        res_act = jnp.dot(state.astype(w.dtype), w,
                          preferred_element_type=jnp.float32)
        new_state = jnp.tanh(u_ref[t].astype(jnp.float32) + res_act)
        if leaking_rate == 1.0:               # static fast path
            state = new_state
        else:
            state = state + a * (new_state - state)
        out_ref[t] = state
        return state

    state_ref[...] = lax.fori_loop(0, time_chunk, step, state_ref[...],
                                   unroll=unroll)


# ----------------------------------------------------------------------------
# Wrapper
# ----------------------------------------------------------------------------
def esn_forward(x_btI, W_in, W_res, *, leaking_rate=1.0, time_chunk=None,
                compute_dtype=jnp.bfloat16):
    """ESN forward pass.

    Args:
      x_btI: (B, T, I) float32 input (PyTorch axis convention).
      W_in:  (R, I+1) float32.
      W_res: (R, R)   float32.
      leaking_rate: leaky-integration factor (static).
      time_chunk: timesteps per grid step (None -> auto, 32-128 scaled by R).
      compute_dtype: dtype for W_res.T / u operands (state/accum stay f32).
    Returns:
      (B, T, R) float32 reservoir states (same as the PyTorch forward()).
    """
    B, T, I = x_btI.shape
    R = W_res.shape[0]

    # ---- padding / tiling geometry -------------------------------------
    R_pad = _round_up(max(R, 128), 128)               # lanes
    B_pad = _round_up(max(B, 8), 8)                   # sublanes
    num_b_tiles = 2 if B_pad >= 16 else 1             # megacore batch split
    Bt = _round_up(_cdiv(B_pad, num_b_tiles), 8)
    B_pad = Bt * num_b_tiles

    w_bytes = jnp.dtype(compute_dtype).itemsize
    u_bytes = jnp.dtype(compute_dtype).itemsize

    # ---- VMEM-budget-driven time_chunk selection ------------------------
    try:
        vmem_cap = int(pltpu.get_tpu_info().vmem_capacity_bytes)
    except Exception:
        vmem_cap = 128 * 1024 * 1024
    budget = min(100 * 1024 * 1024, int(0.9 * vmem_cap))

    fixed = R_pad * R_pad * w_bytes + Bt * R_pad * 4      # resident W + state
    per_step = 2 * Bt * R_pad * (u_bytes + 4)             # dbl-buffered u + out

    if time_chunk is None:
        time_chunk = 128 if R_pad <= 512 else (64 if R_pad <= 2048 else 32)
    tc_budget = max(1, (int(budget / 1.3) - fixed) // per_step)
    tc_target = max(1, min(int(time_chunk), tc_budget, T))

    num_chunks = _cdiv(T, tc_target)
    Tc = _cdiv(T, num_chunks)        # minimizes trailing padded timesteps
    T_pad = Tc * num_chunks

    unroll = 1
    for uf in (8, 4, 2, 1):          # partial unroll; keep code size sane
        if Tc % uf == 0:
            unroll = uf
            break

    vmem_limit = int(1.25 * (fixed + Tc * per_step))
    vmem_limit = max(32 * 1024 * 1024, min(budget, vmem_limit))

    # ---- hoisted input projection, produced time-major directly ---------
    x32 = x_btI.astype(jnp.float32)
    w_in_x = jnp.transpose(W_in[:, :I]).astype(jnp.float32)    # (I, R)
    w_in_b = W_in[:, I].astype(jnp.float32)                    # (R,)
    u_tbR = jnp.einsum("bti,ir->tbr", x32, w_in_x) + w_in_b    # (T, B, R)
    u_tbR = jnp.pad(u_tbR, ((0, T_pad - T), (0, B_pad - B), (0, R_pad - R)))
    u_tbR = u_tbR.astype(compute_dtype)

    w_res_t = jnp.pad(jnp.transpose(W_res),
                      ((0, R_pad - R), (0, R_pad - R))).astype(compute_dtype)

    kernel = functools.partial(_esn_kernel,
                               leaking_rate=float(leaking_rate),
                               time_chunk=Tc, unroll=unroll)

    out_tbR = pl.pallas_call(
        kernel,
        out_shape=jax.ShapeDtypeStruct((T_pad, B_pad, R_pad), jnp.float32),
        grid_spec=pltpu.PrefetchScalarGridSpec(
            num_scalar_prefetch=0,
            grid=(num_b_tiles, num_chunks),
            in_specs=[
                # Precomputed input activations: one (Tc, Bt, R) slab/step.
                pl.BlockSpec((Tc, Bt, R_pad), lambda b, c: (c, b, 0)),
                # W_res.T stays in HBM; copied once per batch tile into VMEM.
                pl.BlockSpec(memory_space=pl.ANY),
            ],
            out_specs=pl.BlockSpec((Tc, Bt, R_pad), lambda b, c: (c, b, 0)),
            scratch_shapes=[
                pltpu.VMEM((R_pad, R_pad), compute_dtype),   # resident W_res.T
                pltpu.VMEM((Bt, R_pad), jnp.float32),        # reservoir state
                pltpu.SemaphoreType.DMA(()),                 # weight-load sem
            ],
        ),
        compiler_params=pltpu.CompilerParams(
            # batch tiles independent (2 TCs on v7x); time is sequential.
            dimension_semantics=("parallel", "arbitrary"),
            vmem_limit_bytes=vmem_limit,
        ),
    )(u_tbR, w_res_t)

    # TODO(synk): a fused readout (fit/predict) could consume the time-major
    # states directly and fold this transpose into its matmul.
    return jnp.transpose(out_tbR, (1, 0, 2))[:B, :T, :R]        # (B, T, R)


# ----------------------------------------------------------------------------
# Pure-JAX reference (mirrors the PyTorch loop) for a correctness check
# ----------------------------------------------------------------------------
def esn_forward_ref(x_btI, W_in, W_res, *, leaking_rate=1.0):
    B, T, I = x_btI.shape
    w_in_x = W_in[:, :I].T
    w_in_b = W_in[:, I][None, :]
    w_res_t = W_res.T

    def step(state, x_t):
        inp = x_t @ w_in_x + w_in_b
        res = state @ w_res_t
        new_state = jnp.tanh(inp + res)
        state = (1.0 - leaking_rate) * state + leaking_rate * new_state
        return state, state

    x_tbI = jnp.transpose(x_btI, (1, 0, 2))
    _, states = lax.scan(step, jnp.zeros((B, W_res.shape[0]), jnp.float32),
                         x_tbI)
    return jnp.transpose(states, (1, 0, 2))


if __name__ == "__main__":
    # Small shapes consistent with the module's forward contract.
    B, T, I, R = 2, 10, 4, 32

    key = jax.random.PRNGKey(0)
    x = jax.random.normal(key, (B, T, I), dtype=jnp.float32)

    W_in, W_res = init_esn_params(I, R, spectral_radius=0.95,
                                  input_scaling=1.0, connectivity=0.1,
                                  bias_scaling=0.0, seed=0)

    ref09 = jax.block_until_ready(
        esn_forward_ref(x, W_in, W_res, leaking_rate=0.9))
    ref10 = jax.block_until_ready(
        esn_forward_ref(x, W_in, W_res, leaking_rate=1.0))

    # 1) f32, multi-chunk time grid (exercises state carry across grid steps
    #    and the T-padding path); bit-tight check against the reference.
    out = jax.block_until_ready(
        esn_forward(x, W_in, W_res, leaking_rate=0.9, time_chunk=4,
                    compute_dtype=jnp.float32))
    assert out.shape == (B, T, R)
    np.testing.assert_allclose(np.asarray(out), np.asarray(ref09),
                               rtol=1e-5, atol=1e-5)

    # 2) f32, auto chunking + leaking_rate==1.0 fast path (blend skipped).
    out = jax.block_until_ready(
        esn_forward(x, W_in, W_res, leaking_rate=1.0,
                    compute_dtype=jnp.float32))
    np.testing.assert_allclose(np.asarray(out), np.asarray(ref10),
                               rtol=1e-5, atol=1e-5)

    # 3) default bf16 compute_dtype (MXU-native); loosened tolerance.
    out = jax.block_until_ready(
        esn_forward(x, W_in, W_res, leaking_rate=0.9))
    np.testing.assert_allclose(np.asarray(out), np.asarray(ref09),
                               rtol=1e-1, atol=1e-1)

    print("KERNEL_OK")
</pallas_src>

<mosaic_0001>
module attributes {stable_mosaic.version = 11 : i64} {
  func.func @_esn_kernel(%arg0: i32, %arg1: i32, %arg2: memref<4x8x128xf32, #tpu.memory_space<vmem>>, %arg3: memref<128x128xf32, #tpu.memory_space<any>>, %arg4: memref<4x8x128xf32, #tpu.memory_space<vmem>>, %arg5: memref<128x128xf32, #tpu.memory_space<vmem>>, %arg6: memref<8x128xf32, #tpu.memory_space<vmem>>, %arg7: memref<!tpu.dma_semaphore, #tpu.memory_space<semaphore_mem>>) attributes {dimension_semantics = [#tpu.dimension_semantics<parallel>, #tpu.dimension_semantics<arbitrary>], iteration_bounds = array<i64: 1, 3>, scalar_prefetch = 0 : i64, scratch_operands = 3 : i64, tpu.core_type = #tpu.core_type<tc>, window_params = [{transform_indices = @transform_0, window_bounds = array<i64: 4, 8, 128>}, {}, {transform_indices = @transform_2, window_bounds = array<i64: 4, 8, 128>}]} {
    %c0_i32 = arith.constant 0 : i32
    %0 = arith.cmpi eq, %arg1, %c0_i32 : i32
    %1 = arith.extui %0 : i1 to i32
    %c0_i32_0 = arith.constant 0 : i32
    %2 = arith.cmpi ne, %1, %c0_i32_0 : i32
    scf.if %2 {
      tpu.enqueue_dma source(%arg3 : memref<128x128xf32, #tpu.memory_space<any>>) target(%arg5 : memref<128x128xf32, #tpu.memory_space<vmem>>) target_semaphore(%arg7 : memref<!tpu.dma_semaphore, #tpu.memory_space<semaphore_mem>>)
      %cst_27 = arith.constant 0.000000e+00 : f32
      %62 = vector.broadcast %cst_27 : f32 to vector<8x128xf32>
      %c0_28 = arith.constant 0 : index
      %c0_29 = arith.constant 0 : index
      %63 = vector.load %arg6[%c0_28, %c0_29] : memref<8x128xf32, #tpu.memory_space<vmem>>, vector<8x128xf32>
      tpu.vector_store %arg6[%c0_28, %c0_29], %62 {strides = array<i32>} : memref<8x128xf32, #tpu.memory_space<vmem>>, vector<8x128xf32>,
      tpu.wait_dma2 semaphore(%arg7 : memref<!tpu.dma_semaphore, #tpu.memory_space<semaphore_mem>>) src(%arg3 : memref<128x128xf32, #tpu.memory_space<any>>) dst(%arg5 : memref<128x128xf32, #tpu.memory_space<vmem>>)
    } else {
    }
    %c0 = arith.constant 0 : index
    %c0_1 = arith.constant 0 : index
    %3 = vector.load %arg5[%c0, %c0_1] : memref<128x128xf32, #tpu.memory_space<vmem>>, vector<128x128xf32>
    %c0_2 = arith.constant 0 : index
    %c0_3 = arith.constant 0 : index
    %4 = vector.load %arg6[%c0_2, %c0_3] : memref<8x128xf32, #tpu.memory_space<vmem>>, vector<8x128xf32>
    %cst = arith.constant 0.899999976 : f32
    %c0_i32_4 = arith.constant 0 : i32
    %cst_5 = arith.constant dense<0.000000e+00> : vector<8x128xf32>
    %5 = tpu.matmul %4, %3, %cst_5 {dimension_numbers = #tpu.dot_dimension_numbers<[1], [0], [0], [1], [0, 0, 1, 1], [], []>} : vector<8x128xf32>, vector<128x128xf32>, vector<8x128xf32> -> vector<8x128xf32>
    %6 = arith.index_cast %c0_i32_4 : i32 to index
    %c0_6 = arith.constant 0 : index
    %c0_7 = arith.constant 0 : index
    %7 = vector.load %arg2[%6, %c0_6, %c0_7] : memref<4x8x128xf32, #tpu.memory_space<vmem>>, vector<1x8x128xf32>
    %8 = vector.shape_cast %7 : vector<1x8x128xf32> to vector<8x128xf32>
    %9 = arith.addf %8, %5 : vector<8x128xf32>
    %10 = math.tanh %9 : vector<8x128xf32>
    %11 = arith.subf %10, %4 : vector<8x128xf32>
    %12 = vector.broadcast %cst : f32 to vector<8x128xf32>
    %13 = arith.mulf %12, %11 : vector<8x128xf32>
    %14 = arith.addf %4, %13 : vector<8x128xf32>
    %15 = arith.index_cast %c0_i32_4 : i32 to index
    %c0_8 = arith.constant 0 : index
    %c0_9 = arith.constant 0 : index
    %16 = vector.load %arg4[%15, %c0_8, %c0_9] : memref<4x8x128xf32, #tpu.memory_space<vmem>>, vector<1x8x128xf32>
    %17 = vector.shape_cast %16 : vector<1x8x128xf32> to vector<8x128xf32>
    %18 = vector.shape_cast %14 : vector<8x128xf32> to vector<1x8x128xf32>
    tpu.vector_store %arg4[%15, %c0_8, %c0_9], %18 {strides = array<i32>} : memref<4x8x128xf32, #tpu.memory_space<vmem>>, vector<1x8x128xf32>,
    %c1_i32 = arith.constant 1 : i32
    %cst_10 = arith.constant dense<0.000000e+00> : vector<8x128xf32>
    %19 = tpu.matmul %14, %3, %cst_10 {dimension_numbers = #tpu.dot_dimension_numbers<[1], [0], [0], [1], [0, 0, 1, 1], [], []>} : vector<8x128xf32>, vector<128x128xf32>, vector<8x128xf32> -> vector<8x128xf32>
    %20 = arith.index_cast %c1_i32 : i32 to index
    %c0_11 = arith.constant 0 : index
    %c0_12 = arith.constant 0 : index
    %21 = vector.load %arg2[%20, %c0_11, %c0_12] : memref<4x8x128xf32, #tpu.memory_space<vmem>>, vector<1x8x128xf32>
    %22 = vector.shape_cast %21 : vector<1x8x128xf32> to vector<8x128xf32>
    %23 = arith.addf %22, %19 : vector<8x128xf32>
    %24 = math.tanh %23 : vector<8x128xf32>
    %25 = arith.subf %24, %14 : vector<8x128xf32>
    %26 = vector.broadcast %cst : f32 to vector<8x128xf32>
    %27 = arith.mulf %26, %25 : vector<8x128xf32>
    %28 = arith.addf %14, %27 : vector<8x128xf32>
    %29 = arith.index_cast %c1_i32 : i32 to index
    %c0_13 = arith.constant 0 : index
    %c0_14 = arith.constant 0 : index
    %30 = vector.load %arg4[%29, %c0_13, %c0_14] : memref<4x8x128xf32, #tpu.memory_space<vmem>>, vector<1x8x128xf32>
    %31 = vector.shape_cast %30 : vector<1x8x128xf32> to vector<8x128xf32>
    %32 = vector.shape_cast %28 : vector<8x128xf32> to vector<1x8x128xf32>
    tpu.vector_store %arg4[%29, %c0_13, %c0_14], %32 {strides = array<i32>} : memref<4x8x128xf32, #tpu.memory_space<vmem>>, vector<1x8x128xf32>,
    %c2_i32 = arith.constant 2 : i32
    %cst_15 = arith.constant dense<0.000000e+00> : vector<8x128xf32>
    %33 = tpu.matmul %28, %3, %cst_15 {dimension_numbers = #tpu.dot_dimension_numbers<[1], [0], [0], [1], [0, 0, 1, 1], [], []>} : vector<8x128xf32>, vector<128x128xf32>, vector<8x128xf32> -> vector<8x128xf32>
    %34 = arith.index_cast %c2_i32 : i32 to index
    %c0_16 = arith.constant 0 : index
    %c0_17 = arith.constant 0 : index
    %35 = vector.load %arg2[%34, %c0_16, %c0_17] : memref<4x8x128xf32, #tpu.memory_space<vmem>>, vector<1x8x128xf32>
    %36 = vector.shape_cast %35 : vector<1x8x128xf32> to vector<8x128xf32>
    %37 = arith.addf %36, %33 : vector<8x128xf32>
    %38 = math.tanh %37 : vector<8x128xf32>
    %39 = arith.subf %38, %28 : vector<8x128xf32>
    %40 = vector.broadcast %cst : f32 to vector<8x128xf32>
    %41 = arith.mulf %40, %39 : vector<8x128xf32>
    %42 = arith.addf %28, %41 : vector<8x128xf32>
    %43 = arith.index_cast %c2_i32 : i32 to index
    %c0_18 = arith.constant 0 : index
    %c0_19 = arith.constant 0 : index
    %44 = vector.load %arg4[%43, %c0_18, %c0_19] : memref<4x8x128xf32, #tpu.memory_space<vmem>>, vector<1x8x128xf32>
    %45 = vector.shape_cast %44 : vector<1x8x128xf32> to vector<8x128xf32>
    %46 = vector.shape_cast %42 : vector<8x128xf32> to vector<1x8x128xf32>
    tpu.vector_store %arg4[%43, %c0_18, %c0_19], %46 {strides = array<i32>} : memref<4x8x128xf32, #tpu.memory_space<vmem>>, vector<1x8x128xf32>,
    %c3_i32 = arith.constant 3 : i32
    %cst_20 = arith.constant dense<0.000000e+00> : vector<8x128xf32>
    %47 = tpu.matmul %42, %3, %cst_20 {dimension_numbers = #tpu.dot_dimension_numbers<[1], [0], [0], [1], [0, 0, 1, 1], [], []>} : vector<8x128xf32>, vector<128x128xf32>, vector<8x128xf32> -> vector<8x128xf32>
    %48 = arith.index_cast %c3_i32 : i32 to index
    %c0_21 = arith.constant 0 : index
    %c0_22 = arith.constant 0 : index
    %49 = vector.load %arg2[%48, %c0_21, %c0_22] : memref<4x8x128xf32, #tpu.memory_space<vmem>>, vector<1x8x128xf32>
    %50 = vector.shape_cast %49 : vector<1x8x128xf32> to vector<8x128xf32>
    %51 = arith.addf %50, %47 : vector<8x128xf32>
    %52 = math.tanh %51 : vector<8x128xf32>
    %53 = arith.subf %52, %42 : vector<8x128xf32>
    %54 = vector.broadcast %cst : f32 to vector<8x128xf32>
    %55 = arith.mulf %54, %53 : vector<8x128xf32>
    %56 = arith.addf %42, %55 : vector<8x128xf32>
    %57 = arith.index_cast %c3_i32 : i32 to index
    %c0_23 = arith.constant 0 : index
    %c0_24 = arith.constant 0 : index
    %58 = vector.load %arg4[%57, %c0_23, %c0_24] : memref<4x8x128xf32, #tpu.memory_space<vmem>>, vector<1x8x128xf32>
    %59 = vector.shape_cast %58 : vector<1x8x128xf32> to vector<8x128xf32>
    %60 = vector.shape_cast %56 : vector<8x128xf32> to vector<1x8x128xf32>
    tpu.vector_store %arg4[%57, %c0_23, %c0_24], %60 {strides = array<i32>} : memref<4x8x128xf32, #tpu.memory_space<vmem>>, vector<1x8x128xf32>,
    %c4_i32 = arith.constant 4 : i32
    %c0_25 = arith.constant 0 : index
    %c0_26 = arith.constant 0 : index
    %61 = vector.load %arg6[%c0_25, %c0_26] : memref<8x128xf32, #tpu.memory_space<vmem>>, vector<8x128xf32>
    tpu.vector_store %arg6[%c0_25, %c0_26], %56 {strides = array<i32>} : memref<8x128xf32, #tpu.memory_space<vmem>>, vector<8x128xf32>,
    return
  }
  func.func @transform_0(%arg0: i32, %arg1: i32) -> (i32, i32, i32) {
    %c0_i32 = arith.constant 0 : i32
    %c0_i32_0 = arith.constant 0 : i32
    return %arg1, %arg0, %c0_i32 : i32, i32, i32
  }
  func.func @transform_2(%arg0: i32, %arg1: i32) -> (i32, i32, i32) {
    %c0_i32 = arith.constant 0 : i32
    %c0_i32_0 = arith.constant 0 : i32
    return %arg1, %arg0, %c0_i32 : i32, i32, i32
  }
}

</mosaic_0001>

<bundles_post_ra>
// kernel: tpu_custom_call.1
= control target key start
LH: loop header
LB: loop body
LE: loop exit
PB: predicated region body
PF: predicated region fallthrough
CT: control target
= control target key end

     0   :  { %7 = vsyncpa [#allocation6], 0  ;;  %s1453_s0 = inlined_call_operand.hbm [shape: f32[12,8,128], index: 0, kind: input, shape index: {}]   ;;  %s1454_s1 = inlined_call_operand.hbm [shape: f32[128,128], index: 1, kind: input, shape index: {}]   ;;  %s1455_s2 = inlined_call_operand.hbm [shape: f32[12,8,128], index: 2, kind: output, shape index: {}]  }
   0x1   :  { %9 = vsyncpa [#allocation6 + $0x1], 0 }
   0x2   :  { %10 = vsyncpa [#allocation7], 0 }
   0x3   :  { %12 = vsyncpa [#allocation7 + $0x1], 0  ;;  %s1184_s9 = smov 0   ;;  %s1186_s10 = smov 0  }
   0x4   :  { %s1188_s11 = smov 0   ;;  %s1190_s12 = smov 0  }
   0x5   :  { %s1192_s13 = smov 0   ;;  %s1194_s14 = smov 0  }
   0x6 LB: > { %s612_s15 = sadd.s32 4294967295, %s1156_s14   ;;  %s613_s16 = sadd.s32 4294967294, %s1156_s14   ;;  %s1156_s14 = sphi %s1194_s14, %s18_s14   ;;  %s1152_s13 = sphi %s1192_s13, %s1469_s13   ;;  %s1148_s12 = sphi %s1190_s12, %s1468_s12   ;;  %s1144_s11 = sphi %s1188_s11, %s1467_s11   ;;  %s1140_s10 = sphi %s1186_s10, %s1466_s10   ;;  %s1136_s9 = sphi %s1184_s9, %s1465_s9  }
   0x7   : > { %s27_s17 = sadd.s32 1, %s1152_s13  ;;  %s39_s18 = sadd.s32 1, %s1144_s11 }
   0x8   : > { %p28_p0 = scmp.ge.s32.totalorder %s27_s17, 3  ;;  %p46_p1 = scmp.ne.s32.totalorder %s1144_s11, %s1140_s10 }
   0x9   : > { %p47_p2 = scmp.eq.s32.totalorder %s1156_s14, 0  ;;  %p52_p3 = scmp.ne.s32.totalorder %s1140_s10, %s1136_s9 }
   0xa   : > { %s1471_s17 = smov (%p28_p0, %s27_s17), 0  ;;  %p53_p5 = scmp.eq.s32.totalorder %s612_s15, 0 }
   0xb   : > { %p1225_p4 = por %p47_p2, %p46_p1  ;;  %s34_s20 = ssub.s32 %s1152_s13, %s1471_s17 }
   0xc   : > { %p78_p6 = scmp.eq.s32.totalorder %s612_s15, 2  ;;  %p37_p7 = scmp.eq.s32.totalorder %s34_s20, 0 }
   0xd   : > { %p1231_p8 = por %p53_p5, %p52_p3  ;;  %p84_p10 = scmp.eq.s32.totalorder %s613_s16, 2 }
   0xe   : > { %p1235_p9 = por %p78_p6, %p46_p1  ;;  %p953_p12 = scmp.lt.s32.totalorder %s1156_s14, 3 }
   0xf   : > { %s1240_s23 = scalar_select %p37_p7, %s1144_s11, %s39_s18  }
  0x10   : > { %s1459_s22 = scalar_select %p1235_p9, 1, 0 }
  0x11   : > { %p1242_p11 = por %p84_p10, %p52_p3  ;;  %s104_s25 = sand.u32 1, %s1144_s11  }
  0x12   : > { %s616_s26 = sshll.u32 %s104_s25, 5  ;;  %s635_s27 = sshll.u32 %s1152_s13, 9 }
  0x13   : > { %s1460_s24 = scalar_select %p1242_p11, 1, 0 }
  0x14   : > { %s1252_s30 = scalar_lea.hbm %s1453_s0, %s635_s27  ;;  %s108_s3 = scalar_lea.vmem [#allocation5], %s616_s26 }
  0x15   : > { %s116_s4 = sshll.u32 %s108_s3, 4  ;;  %p1258_p13 = pnand %p953_p12, %p1225_p4  ;;  %s1254_s4 = int_to_ptr.vmem [resolvable:$true] %s116_s4 }
  0x16   : > { %s1263_s6 = scalar_lea.sflag [#allocation6], %s104_s25  ;;  %s1020_s7 = scalar_lea.hbm %s1252_s30, 512 }
  0x17   : > { %p1021_p1 = scmp.ne.s32.totalorder %s1252_s30, %s1020_s7  ;;  %p1022_p2 = pneg %p1258_p13 }
  0x18   : > { %s1025_s16 = scalar_lea.hbm %s1453_s0, 1536  ;;  %p1026_p4 = scmp.lt.u32.totalorder %s1252_s30, %s1453_s0 }
  0x19   : > { %p1023_p3 = pnand %p1022_p2, %p1021_p1  ;;  %p1027_p6 = scmp.lt.u32.totalorder %s1025_s16, %s1020_s7 }
  0x1a   : > { %p1029_p10 = scmp.lt.u32.totalorder %s1020_s7, %s1252_s30 }
  0x1b   : > { %p1024_p5 = pneg %p1023_p3  ;;  %p1028_p7 = por %p1027_p6, %p1026_p4 }
  0x1d   : > { %p1030_p12 = por %p1029_p10, %p1028_p7 }
  0x1f   : > { %p1031_p0 = pnand %p1030_p12, %p1024_p5 }
  0x21   : > { %1034 = shalt.err (!%p1031_p0)
}
  0x22   : > { %s1035_s20 = scalar_lea.vmem %s1254_s4, 512  ;;  %s1158_s25 = smov [#allocation5]  }
  0x23   : > { %p1036_p1 = scmp.ne.s32.totalorder %s1254_s4, %s1035_s20  ;;  %s1040_s26 = sshll.u32 %s1158_s25, 4  ;;  %s1041_s26 = int_to_ptr.vmem [resolvable:$false] %s1040_s26 }
  0x24   : > { %s1042_s27 = scalar_lea.vmem %s1041_s26, 1024  ;;  %p1043_p9 = scmp.lt.s32.totalorder %s1254_s4, %s1041_s26 }
  0x25   : > { %p1038_p3 = pnand %p1036_p1, %p1022_p2  ;;  %p1044_p4 = scmp.lt.s32.totalorder %s1042_s27, %s1035_s20 }
  0x27   : > { %p1039_p11 = pneg %p1038_p3  ;;  %p1045_p6 = por %p1044_p4, %p1043_p9 }
  0x29   : > { %p1046_p7 = pnand %p1045_p6, %p1039_p11 }
  0x2b   : > { %1049 = shalt.err (!%p1046_p7)
}
  0x2c   : > { %s1159_s28 = smov 128   ;;  %s1160_s29 = smov 8  }
  0x2d   : > { %948 = dma.hbm_to_vmem [thread:$0]  (!%p1258_p13), %s1252_s30, 512, %s1254_s4, %s1263_s6, %s1159_s28, %s1159_s28, %s1160_s29  }
  0x2e   : > { %p124_p0 = scmp.lt.s32.totalorder %s1156_s14, 4  ;;  %p1462_p2 = scmp.ge.s32.totalorder %s1156_s14, 1 }
  0x30   : > { %p125_p5 = pnand %p1462_p2, %p124_p0 }
  0x31   : > { %s1295_s3 = sand.u32 (!%p125_p5), 1, %s1140_s10  }
  0x32   : > { %128 = sbr.rel (%p125_p5) target bundleno = 1052 (0x41c), region = 24  ;;  %s620_s7 = sshll.u32 (!%p125_p5), %s1295_s3, 5 }
  0x33   : > { %s131_s8 = scalar_lea.sflag (!%p125_p5), [#allocation6], %s1295_s3  ;;  %s1299_s15 = scalar_lea.vmem (!%p125_p5), [#allocation5], %s620_s7 }
  0x39   : > { %1125 = dma.done.wait (%p1231_p8), %s131_s8, 512  }
  0x3a   : > { %1127 = vsyncadd (%p1231_p8), %s131_s8, 4294966784  ;;  %s1305_s30 = scalar_lea.vmem [#allocation8], %s620_s7  ;;  %p622_p9 = scmp.ne.s32.totalorder %s1148_s12, 0 }
  0x3b   : > { %s1161_s4 = smov (!%p622_p9), [#allocation2]   ;;  %v1162_v0 = vmov (!%p622_p9), 0.0   ;;  %s1050_s18 = scalar_lea.hbm (!%p622_p9), %s1454_s1, 2048 }
  0x3c   : > { %158 = sbr.rel (%p622_p9) target bundleno = 79 (0x4f), region = 32  ;;  %s166_s5 = sshll.u32 (!%p622_p9), %s1161_s4, 4  ;;  %170 = vst [vmem:[#allocation3] sm:$0xff] (!%p622_p9), %v1162_v0  ;;  %s167_s5 = int_to_ptr.vmem [resolvable:$true] %s166_s5 }
  0x3d   : > { %p1051_p11 = scmp.ne.s32.totalorder (!%p622_p9), %s1454_s1, %s1050_s18  ;;  %p1054_p8 = scmp.lt.u32.totalorder (!%p622_p9), %s1050_s18, %s1454_s1 }
  0x3f   : > { %p1056_p13 = pnand (!%p622_p9), %p1054_p8, %p1051_p11 }
  0x43   : > { %1059 = shalt.err (!%p1056_p13)  }
  0x44   : > { %s1060_s26 = scalar_lea.vmem %s167_s5, 2048  ;;  %p1065_p12 = scmp.lt.s32.totalorder %s167_s5, %s167_s5 }
  0x45   : > { %p1061_p10 = scmp.ne.s32.totalorder %s167_s5, %s1060_s26  ;;  %p1066_p1 = scmp.lt.s32.totalorder %s1060_s26, %s1060_s26 }
  0x47   : > { %p1067_p3 = por %p1066_p1, %p1065_p12 }
  0x49   : > { %p1068_p4 = pnand %p1067_p3, %p1061_p10 }
  0x4b   : > { %1071 = shalt.err (!%p1068_p4)  }
  0x4c   : > { %169 = dma.hbm_to_vmem [thread:$0]  %s1454_s1, 2048, %s167_s5, [#allocation4] }
  0x4d   : > { %1128 = dma.done.wait [#allocation4], 2048 }
  0x4e   : > { %1129 = vsyncadd [#allocation4], 4294965248 }
  0x4f PF: > { %v174_v1 = vld [vmem:[#allocation2] sm:$0xff]  ;;  %v175_v2 = vld [vmem:[#allocation2 + $0x8] sm:$0xff]  ;;  %v176_v3 = vld [vmem:[#allocation2 + $0x10] sm:$0xff]  ;;  %v1163_v4 = vmov 0.0|0.0   ;;  %vm1164_vm0 = vmmov 0   ;;  %v1165_v7 = vmov 0.0  }
  0x50   : > { %845 = vmatprep.subr.bf16.mxu0 %v1163_v4  ;;  %v1321_v5 = vpack.c.bf16 %v175_v2, %v174_v1  ;;  %v177_v6 = vld [vmem:[#allocation2 + $0x18] sm:$0xff]  ;;  %737 = vmatprep.mubr.msk.f32.mxu0 %vm1164_vm0, %v1165_v7  ;;  %v178_v9 = vld [vmem:[#allocation2 + $0x20] sm:$0xff]  ;;  %v179_v10 = vld [vmem:[#allocation2 + $0x28] sm:$0xff]  ;;  %s636_s29 = sshll.u32 %s1148_s12, 9  ;;  %s521_s7 = sshll.u32 %s1305_s30, 4  ;;  %s1404_s7 = int_to_ptr.vmem [resolvable:$true] %s521_s7 }
  0x51   : > { %869 = vmatprep.subr.bf16.mxu1 %v1163_v4  ;;  %772 = vmatprep.mubr.msk.f32.mxu1 %vm1164_vm0, %v1165_v7  ;;  %v1329_v8 = vpack.c.bf16 %v177_v6, %v176_v3  ;;  %v1335_v11 = vpack.c.bf16 %v179_v10, %v178_v9  ;;  %v180_v12 = vld [vmem:[#allocation2 + $0x30] sm:$0xff]  ;;  %v181_v13 = vld [vmem:[#allocation2 + $0x38] sm:$0xff]  ;;  %v182_v15 = vld [vmem:[#allocation2 + $0x40] sm:$0xff]  ;;  %s1402_s5 = scalar_lea.hbm %s1455_s2, %s636_s29  ;;  %s1072_s6 = scalar_lea.vmem %s1404_s7, 512 }
  0x52   : > { %847 = vmatpush3.bf16.msra.mxu0 %v1321_v5  ;;  %871 = vmatpush3.bf16.msra.mxu1 %v1321_v5  ;;  %v1341_v14 = vpack.c.bf16 %v181_v13, %v180_v12  ;;  %v183_v16 = vld [vmem:[#allocation2 + $0x48] sm:$0xff]  ;;  %v184_v18 = vld [vmem:[#allocation2 + $0x50] sm:$0xff]  ;;  %v185_v19 = vld [vmem:[#allocation2 + $0x58] sm:$0xff]  ;;  %p1073_p6 = scmp.ne.s32.totalorder %s1404_s7, %s1072_s6  ;;  %p1463_p7 = scmp.ne.s32.totalorder %s1459_s22, 0 }
  0x53   : > { %848 = vmatprep.subr.bf16.mxu0 %v1163_v4  ;;  %872 = vmatprep.subr.bf16.mxu1 %v1163_v4  ;;  %v1347_v17 = vpack.c.bf16 %v183_v16, %v182_v15  ;;  %v861_v20 = vpack.c.bf16 %v185_v19, %v184_v18  ;;  %v186_v21 = vld [vmem:[#allocation2 + $0x60] sm:$0xff]  ;;  %v187_v22 = vld [vmem:[#allocation2 + $0x68] sm:$0xff]  ;;  %v188_v24 = vld [vmem:[#allocation2 + $0x70] sm:$0xff]  ;;  %s1166_s12 = smov [#allocation8]  }
  0x54   : > { %v864_v23 = vpack.c.bf16 %v187_v22, %v186_v21  ;;  %v189_v25 = vld [vmem:[#allocation2 + $0x78] sm:$0xff]  ;;  %v190_v27 = vld [vmem:[#allocation3] sm:$0xff]  ;;  %v261_v28 = vld [vmem:[%s1299_s15] sm:$0xff]  ;;  %p1074_p0 = pnand %p1073_p6, %p1463_p7  ;;  %s1076_s16 = sshll.u32 %s1166_s12, 4  ;;  %s1077_s16 = int_to_ptr.vmem [resolvable:$false] %s1076_s16 }
  0x55   : > { %v867_v26 = vpack.c.bf16 %v189_v25, %v188_v24  ;;  %v623_v36 = vld [vmem:[%s1299_s15 + $0x8] sm:$0xff]  ;;  %v625_v44 = vld [vmem:[%s1299_s15 + $0x10] sm:$0xff]  ;;  %v627_v52 = vld [vmem:[%s1299_s15 + $0x18] sm:$0xff]  ;;  %s507_s15 = scalar_lea.sflag [#allocation7], %s1295_s3  ;;  %s1078_s18 = scalar_lea.vmem %s1077_s16, 1024 }
  0x56   : > { %850 = vmatpush3.bf16.msra.mxu0 %v1329_v8  ;;  %874 = vmatpush3.bf16.msra.mxu1 %v1329_v8  ;;  %p1075_p2 = pneg %p1074_p0  ;;  %p1079_p5 = scmp.lt.s32.totalorder %s1404_s7, %s1077_s16 }
  0x57   : > { %851 = vmatprep.subr.bf16.mxu0 %v1163_v4  ;;  %875 = vmatprep.subr.bf16.mxu1 %v1163_v4  ;;  %p1080_p9 = scmp.lt.s32.totalorder %s1078_s18, %s1072_s6 }
  0x59   : > { %p1081_p11 = por %p1080_p9, %p1079_p5 }
  0x5a   : > { %853 = vmatpush3.bf16.msra.mxu0 %v1335_v11  ;;  %877 = vmatpush3.bf16.msra.mxu1 %v1335_v11 }
  0x5b   : > { %854 = vmatprep.subr.bf16.mxu0 %v1163_v4  ;;  %878 = vmatprep.subr.bf16.mxu1 %v1163_v4  ;;  %p1082_p8 = pnand %p1081_p11, %p1075_p2 }
  0x5e   : > { %856 = vmatpush3.bf16.msra.mxu0 %v1341_v14  ;;  %880 = vmatpush3.bf16.msra.mxu1 %v1341_v14 }
  0x5f   : > { %857 = vmatprep.subr.bf16.mxu0 %v1163_v4  ;;  %881 = vmatprep.subr.bf16.mxu1 %v1163_v4 }
  0x62   : > { %859 = vmatpush3.bf16.msra.mxu0 %v1347_v17  ;;  %883 = vmatpush3.bf16.msra.mxu1 %v1347_v17 }
  0x63   : > { %860 = vmatprep.subr.bf16.mxu0 %v1163_v4  ;;  %884 = vmatprep.subr.bf16.mxu1 %v1163_v4 }
  0x66   : > { %862 = vmatpush3.bf16.msra.mxu0 %v861_v20  ;;  %886 = vmatpush3.bf16.msra.mxu1 %v861_v20 }
  0x67   : > { %863 = vmatprep.subr.bf16.mxu0 %v1163_v4  ;;  %887 = vmatprep.subr.bf16.mxu1 %v1163_v4 }
  0x6a   : > { %865 = vmatpush3.bf16.msra.mxu0 %v864_v23  ;;  %889 = vmatpush3.bf16.msra.mxu1 %v864_v23 }
  0x6b   : > { %866 = vmatprep.subr.bf16.mxu0 %v1163_v4  ;;  %890 = vmatprep.subr.bf16.mxu1 %v1163_v4 }
  0x6e   : > { %868 = vmatpush3.bf16.msra.mxu0 %v867_v26  ;;  %892 = vmatpush3.bf16.msra.mxu1 %v867_v26 }
  0x6f   : > { %893 = vmatprep.subr.bf16.mxu0 %v1163_v4  ;;  %917 = vmatprep.subr.bf16.mxu1 %v1163_v4 }
  0x71   : > { %738 = vmatmul.mubr.f32.vlgmr.msra.gmra.mrb[0].mxu0 %v190_v27 }
  0x72   : > { %895 = vmatpush3.bf16.msra.mxu0 %v1321_v5  ;;  %807 = vmatprep.mubr.msk.f32.mxu0 %vm1164_vm0, %v1165_v7 }
  0x73   : > { %896 = vmatprep.subr.bf16.mxu0 %v1163_v4 }
  0x76   : > { %898 = vmatpush3.bf16.msra.mxu0 %v1329_v8 }
  0x77   : > { %899 = vmatprep.subr.bf16.mxu0 %v1163_v4 }
  0x7a   : > { %901 = vmatpush3.bf16.msra.mxu0 %v1335_v11 }
  0x7b   : > { %902 = vmatprep.subr.bf16.mxu0 %v1163_v4 }
  0x7e   : > { %904 = vmatpush3.bf16.msra.mxu0 %v1341_v14 }
  0x7f   : > { %905 = vmatprep.subr.bf16.mxu0 %v1163_v4 }
  0x82   : > { %907 = vmatpush3.bf16.msra.mxu0 %v1347_v17 }
  0x83   : > { %908 = vmatprep.subr.bf16.mxu0 %v1163_v4 }
  0x86   : > { %910 = vmatpush3.bf16.msra.mxu0 %v861_v20 }
  0x87   : > { %911 = vmatprep.subr.bf16.mxu0 %v1163_v4 }
  0x8a   : > { %913 = vmatpush3.bf16.msra.mxu0 %v864_v23 }
  0x8b   : > { %914 = vmatprep.subr.bf16.mxu0 %v1163_v4 }
  0x8e   : > { %916 = vmatpush3.bf16.msra.mxu0 %v867_v26 }
 0x144   : > { %v257_v29 = vpop.f32.mrb[0].mxu0 }
 0x145   : > { %v262_v30 = vadd.f32 %v261_v28, %v257_v29  ;;  %v739_v31 = vpop.f32.mrb[1].mxu0 }
 0x147   : > { %1012 = vtanh.f32 %v262_v30 }
 0x151   : > { %v1013_v32 = vpop.eup %1012 }
 0x152   : > { %v264_v33 = vsub.f32 %v1013_v32, %v190_v27 }
 0x154   : > { %v265_v34 = vmul.f32 0.9, %v264_v33 }
 0x156   : > { %v266_v35 = vadd.f32 %v265_v34, %v190_v27 }
 0x158   : > { %267 = vst [vmem:[%s1305_s30] sm:$0xff] %v266_v35  ;;  %773 = vmatmul.mubr.f32.vlgmr.msra.gmra.mrb[0].mxu1 %v266_v35 }
 0x159   : > { %919 = vmatpush3.bf16.msra.mxu1 %v1321_v5  ;;  %842 = vmatprep.mubr.msk.f32.mxu1 %vm1164_vm0, %v1165_v7 }
 0x15a   : > { %920 = vmatprep.subr.bf16.mxu1 %v1163_v4 }
 0x15d   : > { %922 = vmatpush3.bf16.msra.mxu1 %v1329_v8 }
 0x15e   : > { %923 = vmatprep.subr.bf16.mxu1 %v1163_v4 }
 0x161   : > { %925 = vmatpush3.bf16.msra.mxu1 %v1335_v11 }
 0x162   : > { %926 = vmatprep.subr.bf16.mxu1 %v1163_v4 }
 0x165   : > { %928 = vmatpush3.bf16.msra.mxu1 %v1341_v14 }
 0x166   : > { %929 = vmatprep.subr.bf16.mxu1 %v1163_v4 }
 0x169   : > { %931 = vmatpush3.bf16.msra.mxu1 %v1347_v17 }
 0x16a   : > { %932 = vmatprep.subr.bf16.mxu1 %v1163_v4 }
 0x16d   : > { %934 = vmatpush3.bf16.msra.mxu1 %v861_v20 }
 0x16e   : > { %935 = vmatprep.subr.bf16.mxu1 %v1163_v4 }
 0x171   : > { %937 = vmatpush3.bf16.msra.mxu1 %v864_v23 }
 0x172   : > { %938 = vmatprep.subr.bf16.mxu1 %v1163_v4 }
 0x175   : > { %940 = vmatpush3.bf16.msra.mxu1 %v867_v26 }
 0x22b   : > { %v334_v37 = vpop.f32.mrb[0].mxu1 }
 0x22c   : > { %v340_v38 = vadd.f32 %v623_v36, %v334_v37  ;;  %v774_v39 = vpop.f32.mrb[1].mxu1 }
 0x22e   : > { %1014 = vtanh.f32 %v340_v38 }
 0x238   : > { %v1015_v40 = vpop.eup %1014 }
 0x239   : > { %v342_v41 = vsub.f32 %v1015_v40, %v266_v35 }
 0x23b   : > { %v343_v42 = vmul.f32 0.9, %v342_v41 }
 0x23d   : > { %v344_v43 = vadd.f32 %v343_v42, %v266_v35 }
 0x23f   : > { %624 = vst [vmem:[%s1305_s30 + $0x8] sm:$0xff] %v344_v43  ;;  %808 = vmatmul.mubr.f32.vlgmr.msra.gmra.mrb[2].mxu0 %v344_v43 }
 0x312   : > { %v413_v45 = vpop.f32.mrb[2].mxu0 }
 0x313   : > { %v419_v46 = vadd.f32 %v625_v44, %v413_v45  ;;  %v809_v47 = vpop.f32.mrb[3].mxu0 }
 0x315   : > { %1016 = vtanh.f32 %v419_v46 }
 0x31f   : > { %v1017_v48 = vpop.eup %1016 }
 0x320   : > { %v421_v49 = vsub.f32 %v1017_v48, %v344_v43 }
 0x322   : > { %v422_v50 = vmul.f32 0.9, %v421_v49 }
 0x324   : > { %v423_v51 = vadd.f32 %v422_v50, %v344_v43 }
 0x326   : > { %626 = vst [vmem:[%s1305_s30 + $0x10] sm:$0xff] %v423_v51  ;;  %843 = vmatmul.mubr.f32.vlgmr.msra.gmra.mrb[2].mxu1 %v423_v51 }
 0x3f9   : > { %v492_v53 = vpop.f32.mrb[2].mxu1 }
 0x3fa   : > { %v498_v54 = vadd.f32 %v627_v52, %v492_v53  ;;  %v844_v55 = vpop.f32.mrb[3].mxu1 }
 0x3fc   : > { %1018 = vtanh.f32 %v498_v54 }
 0x406   : > { %v1019_v56 = vpop.eup %1018 }
 0x407   : > { %v500_v57 = vsub.f32 %v1019_v56, %v423_v51 }
 0x409   : > { %v501_v58 = vmul.f32 0.9, %v500_v57 }
 0x40b   : > { %v502_v59 = vadd.f32 %v501_v58, %v423_v51 }
 0x40d   : > { %628 = vst [vmem:[%s1305_s30 + $0x18] sm:$0xff] %v502_v59  ;;  %505 = vst [vmem:[#allocation3] sm:$0xff] %v502_v59 }
 0x40e   : > { %1085 = shalt.err (!%p1082_p8)
}
 0x40f   : > { %s1086_s30 = scalar_lea.hbm %s1402_s5, 512  ;;  %s1090_s21 = scalar_lea.hbm %s1455_s2, 1536 }
 0x410   : > { %p1087_p13 = scmp.ne.s32.totalorder %s1402_s5, %s1086_s30  ;;  %p1091_p1 = scmp.lt.u32.totalorder %s1402_s5, %s1455_s2 }
 0x411   : > { %p1092_p3 = scmp.lt.u32.totalorder %s1090_s21, %s1086_s30  ;;  %p1094_p6 = scmp.lt.u32.totalorder %s1086_s30, %s1402_s5 }
 0x412   : > { %p1088_p10 = pnand %p1087_p13, %p1463_p7 }
 0x413   : > { %p1093_p4 = por %p1092_p3, %p1091_p1 }
 0x414   : > { %p1089_p12 = pneg %p1088_p10 }
 0x415   : > { %p1095_p0 = por %p1094_p6, %p1093_p4 }
 0x417   : > { %p1096_p2 = pnand %p1095_p0, %p1089_p12 }
 0x419   : > { %1099 = shalt.err (!%p1096_p2)
}
 0x41a   : > { %s1167_s27 = smov 128   ;;  %s1168_s28 = smov 8  }
 0x41b   : > { %943 = dma.vmem_to_hbm [thread:$0]  (%p1463_p7), %s1404_s7, 512, %s1402_s5, %s507_s15, %s1167_s27, %s1167_s27, %s1168_s28  }
 0x41c PF: > { %p954_p5 = scmp.ge.s32.totalorder %s1156_s14, 2  ;;  %s536_s29 = sand.u32 1, %s1136_s9  }
 0x41d   : > { %p1464_p9 = scmp.ne.s32.totalorder %s1460_s24, 0  ;;  %s537_s8 = scalar_lea.sflag [#allocation7], %s536_s29 }
 0x41f   : > { %p950_p11 = pnand %p954_p5, %p1464_p9 }
 0x421   : > { %1131 = dma.done.wait (!%p950_p11), %s537_s8, 512  }
 0x422   : > { %1133 = vsyncadd (!%p950_p11), %s537_s8, 4294966784  ;;  %s18_s14 = sadd.s32 1, %s1156_s14   ;;  %s1465_s9 = smov %s1140_s10 }
 0x423   : > { %p15_p8 = scmp.ge.s32.totalorder %s18_s14, 5   ;;  %s1466_s10 = smov %s1144_s11 }
 0x424   : > { %s1467_s11 = smov %s1240_s23  ;;  %s1468_s12 = smov %s1152_s13 }
 0x425   : > { %s1469_s13 = smov %s1471_s17  ;;  %17 = sbr.rel (!%p15_p8) target bundleno = 6 (0x6), region = 83 }
 0x42c   :  { %542 = vsyncpa [#allocation6], 1 }
 0x42d   :  { %544 = vsyncpa [#allocation6 + $0x1], 1 }
 0x42e   :  { %545 = vsyncpa [#allocation7], 1 }
 0x42f   :  { %547 = vsyncpa [#allocation7 + $0x1], 1 }
 0x430   :  { %548 = vsyncmov [#allocation4] }
 0x433   :  { %s549_s22 = vpop.sfrf %548 }
 0x434   :  { %p634_p7 = scmp.ne.s32.totalorder %s549_s22, 0 }
 0x436   :  { %553 = shalt.err (%p634_p7)  }

</bundles_post_ra>
